<compile_context>
chip_gen: v5e
topology: v5e:2x2
jax: 0.10.0
libtpu: 0.0.40
codegen_flags: <defaults>
</compile_context>

<pallas_src>
import jax
import jax.numpy as jnp
from jax.experimental import pallas as pl
from jax.experimental.pallas import tpu as pltpu

HIDDEN_DIM = 10
EPS = 1e-5


def _bn_feature_major(a, gamma_col, beta_col):
    """Training-mode BatchNorm1d on a feature-major (H, N) tile.

    Normalizes over the lane (batch) axis; gamma/beta are (H, 1) columns.
    The centered tensor is computed once and reused for variance + normalize.
    """
    mu = jnp.mean(a, axis=1, keepdims=True)                  # (H, 1)
    centered = a - mu
    var = jnp.mean(centered * centered, axis=1, keepdims=True)
    return centered * jax.lax.rsqrt(var + EPS) * gamma_col + beta_col


def disparity_kernel(x_ref, p_ref, o_ref):
    xT = x_ref[...]                       # (2, N)  batch on lanes
    p = p_ref[...]                        # (H, 18) packed parameters
    h_dim = p.shape[0]

    w1 = p[:, 0:2]                        # Linear1 weight (out, in) = (H, 2)
    g1 = p[:, 2:3]                        # BN1 gamma  (H, 1)
    be1 = p[:, 3:4]                       # BN1 beta   (H, 1)
    w2 = p[:, 4:4 + h_dim]                # Linear2 weight (H, H)
    g2 = p[:, 4 + h_dim:5 + h_dim]        # BN2 gamma  (H, 1)
    be2 = p[:, 5 + h_dim:6 + h_dim]       # BN2 beta   (H, 1)
    w3 = p[:, 6 + h_dim:7 + h_dim]        # Linear3 weight as (H, 1) column
    b3 = p[0:1, 7 + h_dim:8 + h_dim]      # Linear3 bias, (1, 1)

    # Layer 1: Linear(2, H) as two VPU broadcast-FMAs (K=2 is pure MXU overhead).
    # b1 is omitted: training-mode BatchNorm cancels it exactly.
    a1 = w1[:, 0:1] * xT[0:1, :] + w1[:, 1:2] * xT[1:2, :]   # (H, N)
    h1 = jnp.maximum(_bn_feature_major(a1, g1, be1), 0.0)

    # Layer 2: Linear(H, H) on the MXU (b2 likewise cancelled by BatchNorm).
    a2 = jnp.dot(w2, h1, preferred_element_type=jnp.float32)  # (H, N)
    h2 = jnp.maximum(_bn_feature_major(a2, g2, be2), 0.0)

    # Layer 3: Linear(H, 1) as a weighted sublane reduction (N_out=1), + sigmoid.
    z = jnp.sum(w3 * h2, axis=0, keepdims=True) + b3          # (1, N)
    # exp issues to the EUP; the single (1, N)-wide divide on the VPU is negligible.
    o_ref[...] = 1.0 / (1.0 + jnp.exp(-z))


def disparity_forward(xy, packed_params):
    """xy: (N, 2) float32 -> (N, 1) float32.

    NOTE: for tiny batches (N << 1024) a plain XLA-fused MLP is faster than any
    pallas_call (launch + DMA setup dominates); the Pallas path targets the
    larger, bandwidth-bound regime.
    """
    n = xy.shape[0]
    x_t = xy.T                            # (2, N): put the batch on the lane axis
    vmem = pl.BlockSpec(memory_space=pltpu.VMEM)
    out = pl.pallas_call(
        disparity_kernel,
        out_shape=jax.ShapeDtypeStruct((1, n), jnp.float32),
        in_specs=[vmem, vmem],
        out_specs=vmem,
    )(x_t, packed_params)
    return out.reshape(n, 1)              # lane-dense slab -> (N, 1)


def init_params(key, hidden_dim):
    # PyTorch-style init: Linear weights are (out_features, in_features),
    # uniform(-1/sqrt(fan_in), 1/sqrt(fan_in)); BN gamma=1, beta=0.
    ks = jax.random.split(key, 6)

    def lin(kw, kb, fan_in, fan_out):
        bound = 1.0 / jnp.sqrt(float(fan_in))
        w = jax.random.uniform(kw, (fan_out, fan_in), jnp.float32, -bound, bound)
        b = jax.random.uniform(kb, (fan_out,), jnp.float32, -bound, bound)
        return w, b

    w1, b1 = lin(ks[0], ks[1], 2, hidden_dim)
    w2, b2 = lin(ks[2], ks[3], hidden_dim, hidden_dim)
    w3, b3 = lin(ks[4], ks[5], hidden_dim, 1)

    g1 = jnp.ones((hidden_dim,), jnp.float32)
    be1 = jnp.zeros((hidden_dim,), jnp.float32)
    g2 = jnp.ones((hidden_dim,), jnp.float32)
    be2 = jnp.zeros((hidden_dim,), jnp.float32)
    return (w1, b1, g1, be1, w2, b2, g2, be2, w3, b3)


def pack_params(params):
    """Pack all kernel-side parameters into a single (H, 18) f32 array.

    b1/b2 are intentionally dropped: a bias immediately followed by
    training-mode BatchNorm is a mathematical no-op.
    """
    (w1, _b1, g1, be1, w2, _b2, g2, be2, w3, b3) = params
    h = w1.shape[0]
    b3_col = jnp.zeros((h, 1), jnp.float32).at[0, 0].set(b3.reshape(()))
    return jnp.concatenate(
        [w1,                         # cols [0, 2)     Linear1 weight (out, in)
         g1.reshape(h, 1),           # col   2         BN1 gamma
         be1.reshape(h, 1),          # col   3         BN1 beta
         w2,                         # cols [4, 4+H)   Linear2 weight (out, in)
         g2.reshape(h, 1),           # col   4+H       BN2 gamma
         be2.reshape(h, 1),          # col   5+H       BN2 beta
         w3.reshape(h, 1),           # col   6+H       Linear3 weight (column)
         b3_col],                    # col   7+H       Linear3 bias at row 0
        axis=1).astype(jnp.float32)


def reference_forward(xy, params):
    # Pure-JAX reference with full PyTorch semantics (including b1/b2, which the
    # kernel omits because training-mode BatchNorm cancels them).
    (w1, b1, g1, be1, w2, b2, g2, be2, w3, b3) = params

    def bn(h, g, be):
        mu = jnp.mean(h, axis=0, keepdims=True)
        var = jnp.mean((h - mu) ** 2, axis=0, keepdims=True)
        return (h - mu) / jnp.sqrt(var + EPS) * g + be

    h = jnp.maximum(bn(xy @ w1.T + b1, g1, be1), 0.0)
    h = jnp.maximum(bn(h @ w2.T + b2, g2, be2), 0.0)
    return jax.nn.sigmoid(h @ w3.T + b3)


if __name__ == "__main__":
    key = jax.random.PRNGKey(0)
    k_x, k_p = jax.random.split(key)

    batch = 256                      # small but lane-dense (multiple of 128)
    xy = jax.random.normal(k_x, (batch, 2), jnp.float32)
    params = init_params(k_p, HIDDEN_DIM)
    packed = pack_params(params)

    out = disparity_forward(xy, packed)
    out = jax.block_until_ready(out)

    ref = reference_forward(xy, params)
    assert out.shape == (batch, 1)
    # Slightly loose tolerance: the kernel folds the BN-cancelled biases away,
    # which changes rounding by a few ULPs relative to the bias-carrying reference.
    assert jnp.allclose(out, ref, atol=2e-5, rtol=1e-4), (
        float(jnp.max(jnp.abs(out - ref))))

    print("KERNEL_OK")
</pallas_src>

<mosaic_0001>
module attributes {stable_mosaic.version = 11 : i64} {
  func.func @disparity_kernel(%arg0: memref<2x256xf32, #tpu.memory_space<vmem>>, %arg1: memref<10x18xf32, #tpu.memory_space<vmem>>, %arg2: memref<1x256xf32, #tpu.memory_space<vmem>>) attributes {dimension_semantics = [], scalar_prefetch = 0 : i64, scratch_operands = 0 : i64, tpu.core_type = #tpu.core_type<tc>} {
    %c0 = arith.constant 0 : index
    %c0_0 = arith.constant 0 : index
    %0 = vector.load %arg0[%c0, %c0_0] : memref<2x256xf32, #tpu.memory_space<vmem>>, vector<2x256xf32>
    %c0_1 = arith.constant 0 : index
    %c0_2 = arith.constant 0 : index
    %1 = vector.load %arg1[%c0_1, %c0_2] : memref<10x18xf32, #tpu.memory_space<vmem>>, vector<10x18xf32>
    %2 = vector.extract_strided_slice %1 {offsets = [0, 0], sizes = [10, 2], strides = [1, 1]} : vector<10x18xf32> to vector<10x2xf32>
    %3 = vector.extract_strided_slice %1 {offsets = [0, 2], sizes = [10, 1], strides = [1, 1]} : vector<10x18xf32> to vector<10x1xf32>
    %4 = vector.extract_strided_slice %1 {offsets = [0, 3], sizes = [10, 1], strides = [1, 1]} : vector<10x18xf32> to vector<10x1xf32>
    %5 = vector.extract_strided_slice %1 {offsets = [0, 4], sizes = [10, 10], strides = [1, 1]} : vector<10x18xf32> to vector<10x10xf32>
    %6 = vector.extract_strided_slice %1 {offsets = [0, 14], sizes = [10, 1], strides = [1, 1]} : vector<10x18xf32> to vector<10x1xf32>
    %7 = vector.extract_strided_slice %1 {offsets = [0, 15], sizes = [10, 1], strides = [1, 1]} : vector<10x18xf32> to vector<10x1xf32>
    %8 = vector.extract_strided_slice %1 {offsets = [0, 16], sizes = [10, 1], strides = [1, 1]} : vector<10x18xf32> to vector<10x1xf32>
    %9 = vector.extract_strided_slice %1 {offsets = [0, 17], sizes = [1, 1], strides = [1, 1]} : vector<10x18xf32> to vector<1x1xf32>
    %10 = vector.extract_strided_slice %2 {offsets = [0, 0], sizes = [10, 1], strides = [1, 1]} : vector<10x2xf32> to vector<10x1xf32>
    %11 = vector.extract_strided_slice %0 {offsets = [0, 0], sizes = [1, 256], strides = [1, 1]} : vector<2x256xf32> to vector<1x256xf32>
    %12 = vector.broadcast %10 : vector<10x1xf32> to vector<10x256xf32>
    %13 = vector.broadcast %11 : vector<1x256xf32> to vector<10x256xf32>
    %14 = arith.mulf %12, %13 : vector<10x256xf32>
    %15 = vector.extract_strided_slice %2 {offsets = [0, 1], sizes = [10, 1], strides = [1, 1]} : vector<10x2xf32> to vector<10x1xf32>
    %16 = vector.extract_strided_slice %0 {offsets = [1, 0], sizes = [1, 256], strides = [1, 1]} : vector<2x256xf32> to vector<1x256xf32>
    %17 = vector.broadcast %15 : vector<10x1xf32> to vector<10x256xf32>
    %18 = vector.broadcast %16 : vector<1x256xf32> to vector<10x256xf32>
    %19 = arith.mulf %17, %18 : vector<10x256xf32>
    %20 = arith.addf %14, %19 : vector<10x256xf32>
    %cst = arith.constant dense<0.000000e+00> : vector<10xf32>
    %21 = vector.multi_reduction <add>, %20, %cst [1] : vector<10x256xf32> to vector<10xf32>
    %22 = vector.shape_cast %21 : vector<10xf32> to vector<10x1xf32>
    %cst_3 = arith.constant 2.560000e+02 : f32
    %23 = vector.broadcast %cst_3 : f32 to vector<10x1xf32>
    %24 = arith.divf %22, %23 : vector<10x1xf32>
    %25 = vector.broadcast %24 : vector<10x1xf32> to vector<10x256xf32>
    %26 = arith.subf %20, %25 : vector<10x256xf32>
    %27 = arith.mulf %26, %26 : vector<10x256xf32>
    %cst_4 = arith.constant dense<0.000000e+00> : vector<10xf32>
    %28 = vector.multi_reduction <add>, %27, %cst_4 [1] : vector<10x256xf32> to vector<10xf32>
    %29 = vector.shape_cast %28 : vector<10xf32> to vector<10x1xf32>
    %cst_5 = arith.constant 2.560000e+02 : f32
    %30 = vector.broadcast %cst_5 : f32 to vector<10x1xf32>
    %31 = arith.divf %29, %30 : vector<10x1xf32>
    %cst_6 = arith.constant 9.99999974E-6 : f32
    %32 = vector.broadcast %cst_6 : f32 to vector<10x1xf32>
    %33 = arith.addf %31, %32 : vector<10x1xf32>
    %34 = math.rsqrt %33 : vector<10x1xf32>
    %35 = vector.broadcast %34 : vector<10x1xf32> to vector<10x256xf32>
    %36 = arith.mulf %26, %35 : vector<10x256xf32>
    %37 = vector.broadcast %3 : vector<10x1xf32> to vector<10x256xf32>
    %38 = arith.mulf %36, %37 : vector<10x256xf32>
    %39 = vector.broadcast %4 : vector<10x1xf32> to vector<10x256xf32>
    %40 = arith.addf %38, %39 : vector<10x256xf32>
    %cst_7 = arith.constant 0.000000e+00 : f32
    %41 = vector.broadcast %cst_7 : f32 to vector<10x256xf32>
    %42 = arith.maximumf %40, %41 : vector<10x256xf32>
    %cst_8 = arith.constant dense<0.000000e+00> : vector<10x256xf32>
    %43 = tpu.matmul %5, %42, %cst_8 {dimension_numbers = #tpu.dot_dimension_numbers<[1], [0], [0], [1], [0, 0, 1, 1], [], []>} : vector<10x10xf32>, vector<10x256xf32>, vector<10x256xf32> -> vector<10x256xf32>
    %cst_9 = arith.constant dense<0.000000e+00> : vector<10xf32>
    %44 = vector.multi_reduction <add>, %43, %cst_9 [1] : vector<10x256xf32> to vector<10xf32>
    %45 = vector.shape_cast %44 : vector<10xf32> to vector<10x1xf32>
    %cst_10 = arith.constant 2.560000e+02 : f32
    %46 = vector.broadcast %cst_10 : f32 to vector<10x1xf32>
    %47 = arith.divf %45, %46 : vector<10x1xf32>
    %48 = vector.broadcast %47 : vector<10x1xf32> to vector<10x256xf32>
    %49 = arith.subf %43, %48 : vector<10x256xf32>
    %50 = arith.mulf %49, %49 : vector<10x256xf32>
    %cst_11 = arith.constant dense<0.000000e+00> : vector<10xf32>
    %51 = vector.multi_reduction <add>, %50, %cst_11 [1] : vector<10x256xf32> to vector<10xf32>
    %52 = vector.shape_cast %51 : vector<10xf32> to vector<10x1xf32>
    %cst_12 = arith.constant 2.560000e+02 : f32
    %53 = vector.broadcast %cst_12 : f32 to vector<10x1xf32>
    %54 = arith.divf %52, %53 : vector<10x1xf32>
    %cst_13 = arith.constant 9.99999974E-6 : f32
    %55 = vector.broadcast %cst_13 : f32 to vector<10x1xf32>
    %56 = arith.addf %54, %55 : vector<10x1xf32>
    %57 = math.rsqrt %56 : vector<10x1xf32>
    %58 = vector.broadcast %57 : vector<10x1xf32> to vector<10x256xf32>
    %59 = arith.mulf %49, %58 : vector<10x256xf32>
    %60 = vector.broadcast %6 : vector<10x1xf32> to vector<10x256xf32>
    %61 = arith.mulf %59, %60 : vector<10x256xf32>
    %62 = vector.broadcast %7 : vector<10x1xf32> to vector<10x256xf32>
    %63 = arith.addf %61, %62 : vector<10x256xf32>
    %cst_14 = arith.constant 0.000000e+00 : f32
    %64 = vector.broadcast %cst_14 : f32 to vector<10x256xf32>
    %65 = arith.maximumf %63, %64 : vector<10x256xf32>
    %66 = vector.broadcast %8 : vector<10x1xf32> to vector<10x256xf32>
    %67 = arith.mulf %66, %65 : vector<10x256xf32>
    %cst_15 = arith.constant dense<0.000000e+00> : vector<256xf32>
    %68 = vector.multi_reduction <add>, %67, %cst_15 [0] : vector<10x256xf32> to vector<256xf32>
    %69 = vector.shape_cast %68 : vector<256xf32> to vector<1x256xf32>
    %70 = vector.broadcast %9 : vector<1x1xf32> to vector<1x256xf32>
    %71 = arith.addf %69, %70 : vector<1x256xf32>
    %cst_16 = arith.constant 0.000000e+00 : f32
    %72 = vector.broadcast %cst_16 : f32 to vector<1x256xf32>
    %73 = arith.subf %72, %71 : vector<1x256xf32>
    %74 = math.exp %73 : vector<1x256xf32>
    %cst_17 = arith.constant 1.000000e+00 : f32
    %75 = vector.broadcast %cst_17 : f32 to vector<1x256xf32>
    %76 = arith.addf %75, %74 : vector<1x256xf32>
    %cst_18 = arith.constant 1.000000e+00 : f32
    %77 = vector.broadcast %cst_18 : f32 to vector<1x256xf32>
    %78 = arith.divf %77, %76 : vector<1x256xf32>
    %c0_19 = arith.constant 0 : index
    %c0_20 = arith.constant 0 : index
    %79 = vector.load %arg2[%c0_19, %c0_20] : memref<1x256xf32, #tpu.memory_space<vmem>>, vector<1x256xf32>
    tpu.vector_store %arg2[%c0_19, %c0_20], %78 {strides = array<i32>} : memref<1x256xf32, #tpu.memory_space<vmem>>, vector<1x256xf32>,
    return
  }
}

</mosaic_0001>

<bundles_post_ra>
// kernel: tpu_custom_call.1
= control target key start
LH: loop header
LB: loop body
LE: loop exit
PB: predicated region body
PF: predicated region fallthrough
CT: control target
= control target key end

     0   :  { %7 = vsyncpa [#allocation3], 0  ;;  %s651_s0 = inlined_call_operand.hbm [shape: f32[2,256], index: 0, kind: input, shape index: {}]   ;;  %s652_s1 = inlined_call_operand.hbm [shape: f32[10,18], index: 1, kind: input, shape index: {}]   ;;  %s653_s2 = inlined_call_operand.hbm [shape: f32[1,256], index: 2, kind: output, shape index: {}]  }
   0x1   :  { %8 = vsyncpa [#allocation6], 0 }
   0x2   :  { %9 = vsyncpa [#allocation4], 0  ;;  %s15_s11 = sshll.u32 %s651_s0, 4  ;;  %s557_s12 = smov [#allocation2]   ;;  %s16_s11 = int_to_ptr.hbm [resolvable:$true] %s15_s11 }
   0x3   :  { %s17_s13 = sshll.u32 %s557_s12, 4  ;;  %s25_s16 = sshll.u32 %s652_s1, 4  ;;  %s18_s13 = int_to_ptr.vmem [resolvable:$true] %s17_s13  ;;  %s26_s16 = int_to_ptr.hbm [resolvable:$true] %s25_s16 }
   0x4   :  { %20 = dma.hbm_to_vmem [thread:$0]  %s16_s11, 64, %s18_s13, [#allocation3]  }
   0x5   :  { %s558_s17 = smov [#allocation5]   ;;  %s559_s19 = smov 128  }
   0x6   :  { %s27_s18 = sshll.u32 %s558_s17, 4  ;;  %s560_s20 = smov 8   ;;  %s28_s18 = int_to_ptr.vmem [resolvable:$true] %s27_s18 }
   0x7   :  { %33 = dma.hbm_to_vmem [thread:$0]  %s26_s16, 256, %s28_s18, [#allocation6], %s559_s19, %s559_s19, %s560_s20  }
   0x8   :  { %551 = dma.done.wait [#allocation3], 64  }
   0x9   :  { %552 = vsyncadd [#allocation3], 4294967232 }
   0xa   :  { %553 = dma.done.wait [#allocation6], 256  }
   0xb   :  { %554 = vsyncadd [#allocation6], 4294967040  ;;  %v561_v0 = vmov 0   ;;  %v593_v1 = vld [vmem:[#allocation5 + $0x8] sm:$0x3]  ;;  %v595_v2 = vld [vmem:[#allocation5] sm:$0xff] }
   0xc   :  { %449 = vset.pattern.permute.xlu1 %v561_v0  ;;  %447 = vset.pattern.permute.xlu0 %v561_v0  ;;  %v562_v3 = vmov 1   ;;  %v42_v4 = vld [vmem:[#allocation2] sm:$0xf]  ;;  %vm91_vm0 = vcmask 1041408   ;;  %v563_v33 = vmov 256.0   ;;  %v564_v37 = vmov 2  }
   0xd   :  { %52 = vperm.xlu0 %447, %v593_v1   ;;  %47 = vperm.xlu1 %449, %v595_v2   ;;  %v56_v6 = vperm.slane %v42_v4, 0  ;;  %v57_v7 = vperm.slane %v42_v4, 2  ;;  %v74_v9 = vperm.slane %v42_v4, 1  ;;  %v75_v10 = vperm.slane %v42_v4, 3  ;;  %s566_s0 = smov 124   ;;  %s571_s1 = smov [#allocation7]  }
   0xe   :  { %461 = vrcp.f32 %v563_v33  ;;  %452 = vset.pattern.permute.xlu2 %v564_v37  ;;  %v565_v40 = vmov 3   ;;  %v567_v0 = vmov 14   ;;  %vm182_vm8 = vcmask 80896   ;;  %s409_s21 = sshll.u32 %s571_s1, 4  ;;  %s411_s24 = sshll.u32 %s653_s2, 4  ;;  %s410_s21 = int_to_ptr.vmem [resolvable:$true] %s409_s21  ;;  %s412_s24 = int_to_ptr.hbm [resolvable:$true] %s411_s24 }
   0xf   :  { %v60_v11 = vperm.slane %v56_v6, 0  ;;  %v61_v12 = vperm.slane %v57_v7, 0  ;;  %v78_v13 = vperm.slane %v74_v9, 1  ;;  %v79_v14 = vperm.slane %v75_v10, 1 }
  0x14   :  { %v462_v34 = vpop.eup %461 }
  0x15   :  { %448 = vset.pattern.permute.xlu0 %v562_v3  ;;  %450 = vset.pattern.permute.xlu1 %v562_v3  ;;  %v98_v35 = vmul.f32 256.0, %v462_v34  ;;  %vm102_vm1 = vweird.f32 %v462_v34 }
  0x16   :  { %71 = vperm.xlu0 %448, %v593_v1   ;;  %67 = vperm.xlu1 %450, %v595_v2  }
  0x17   :  { %v99_v36 = vsub.f32 1.0, %v98_v35 }
  0x19   :  { %v100_v38 = vmul.f32 %v462_v34, %v99_v36 }
  0x1b   :  { %v101_v39 = vadd.f32 %v462_v34, %v100_v38 }
  0x1d   :  { %v605_v41 = vsel %vm102_vm1, %v462_v34, %v101_v39 }
  0x1e   :  { %451 = vset.pattern.permute.xlu0 %v564_v37  ;;  %455 = vset.pattern.permute.xlu1 %v567_v0  ;;  %v570_v0 = vmov 17  }
  0x1f   :  { %155 = vperm.xlu0 %451, %v593_v1  }
  0x27   :  { %453 = vset.pattern.permute.xlu0 %v565_v40 }
  0x28   :  { %167 = vperm.xlu0 %453, %v593_v1  }
  0x30   :  { %180 = vrot.lane.b32.xlu0 %v593_v1, %s566_s0 }
  0x7f   :  { %v53_v5 = vpop.permute.xlu0 %52  ;;  %v48_v8 = vpop.permute.xlu1 %47 }
  0x80   :  { %v64_v16 = vmul.f32 %v60_v11, %v53_v5  ;;  %v65_v17 = vmul.f32 %v61_v12, %v53_v5  ;;  %v62_v23 = vmul.f32 %v60_v11, %v48_v8  ;;  %v63_v26 = vmul.f32 %v61_v12, %v48_v8 }
  0x88   :  { %v72_v15 = vpop.permute.xlu0 %71  ;;  %v68_v20 = vpop.permute.xlu1 %67 }
  0x89   :  { %v82_v18 = vmul.f32 %v78_v13, %v72_v15  ;;  %v83_v19 = vmul.f32 %v79_v14, %v72_v15  ;;  %v80_v27 = vmul.f32 %v78_v13, %v68_v20  ;;  %v81_v28 = vmul.f32 %v79_v14, %v68_v20 }
  0x8b   :  { %v86_v21 = vadd.f32 %v82_v18, %v64_v16  ;;  %v87_v22 = vadd.f32 %v83_v19, %v65_v17  ;;  %v84_v30 = vadd.f32 %v80_v27, %v62_v23  ;;  %v85_v31 = vadd.f32 %v81_v28, %v63_v26 }
  0x8d   :  { %v92_v24 = vsel %vm91_vm0, %v86_v21, 0.0  ;;  %v93_v25 = vsel %vm91_vm0, %v87_v22, 0.0  ;;  %v88_v32 = vadd.f32 %v85_v31, %v84_v30 }
  0x8e   :  { %v94_v29 = vadd.f32 %v93_v25, %v92_v24 }
  0x90   :  { %95 = vadd.xlane.f32.xlu2 %v94_v29 }
  0x91   :  { %v156_v6 = vpop.permute.xlu0 %155 }
  0x98   :  { %89 = vadd.xlane.f32.xlu2 %v88_v32 }
  0x9a   :  { %v168_v18 = vpop.permute.xlu0 %167 }
  0xa2   :  { %v181_v37 = vpop.permute.xlu0 %180 }
 0x103   :  { %v96_v42 = vpop.xlane.xlu2 %95 }
 0x104   :  { %v105_v43 = vmul.f32 %v605_v41, %v96_v42 }
 0x106   :  { %v108_v44 = vsub.f32 %v86_v21, %v105_v43  ;;  %v109_v45 = vsub.f32 %v87_v22, %v105_v43 }
 0x108   :  { %v112_v46 = vmul.f32 %v108_v44, %v108_v44  ;;  %v113_v47 = vmul.f32 %v109_v45, %v109_v45 }
 0x10a   :  { %v117_v48 = vsel %vm91_vm0, %v112_v46, 0.0  ;;  %v118_v49 = vsel %vm91_vm0, %v113_v47, 0.0 }
 0x10b   :  { %v90_v50 = vpop.xlane.xlu2 %89  ;;  %v119_v51 = vadd.f32 %v118_v49, %v117_v48 }
 0x10c   :  { %v104_v52 = vmul.f32 %v605_v41, %v90_v50  ;;  %v568_v50 = vmov 16  }
 0x10d   :  { %120 = vadd.xlane.f32.xlu1 %v119_v51 }
 0x10e   :  { %v106_v53 = vsub.f32 %v84_v30, %v104_v52  ;;  %v107_v54 = vsub.f32 %v85_v31, %v104_v52 }
 0x110   :  { %v110_v55 = vmul.f32 %v106_v53, %v106_v53  ;;  %v111_v56 = vmul.f32 %v107_v54, %v107_v54 }
 0x112   :  { %v114_v57 = vadd.f32 %v111_v56, %v110_v55 }
 0x114   :  { %115 = vadd.xlane.f32.xlu2 %v114_v57 }
 0x126   :  { %298 = vperm.xlu1 %455, %v593_v1  }
 0x12c   :  { %151 = vperm.xlu2 %452, %v595_v2  }
 0x134   :  { %454 = vset.pattern.permute.xlu2 %v565_v40 }
 0x135   :  { %163 = vperm.xlu2 %454, %v595_v2  }
 0x13d   :  { %178 = vrot.lane.b32.xlu2 %v595_v2, %s566_s0 }
 0x180   :  { %v121_v58 = vpop.xlane.xlu1 %120 }
 0x181   :  { %v123_v59 = vmul.f32 %v121_v58, %v605_v41 }
 0x183   :  { %v125_v60 = vadd.f32 1e-05, %v123_v59 }
 0x185   :  { %463 = vrsqrt.f32 %v125_v60  ;;  %vm142_vm3 = vweird.f32 %v125_v60 }
 0x187   :  { %v116_v61 = vpop.xlane.xlu2 %115 }
 0x188   :  { %v122_v62 = vmul.f32 %v116_v61, %v605_v41 }
 0x18a   :  { %v124_v63 = vadd.f32 1e-05, %v122_v62 }
 0x18b   :  { %v464_v3 = vpop.eup %463 }
 0x18c   :  { %v137_v4 = vmul.f32 %v464_v3, %v125_v60  ;;  %465 = vrsqrt.f32 %v124_v63  ;;  %vm143_vm2 = vweird.f32 %v464_v3  ;;  %vm132_vm6 = vweird.f32 %v124_v63 }
 0x18d   :  { %vm144_vm4 = vmor %vm142_vm3, %vm143_vm2 }
 0x18e   :  { %v138_v5 = vmul.f32 %v464_v3, %v137_v4 }
 0x18f   :  { %v152_v8 = vpop.permute.xlu2 %151 }
 0x190   :  { %v139_v7 = vmul.f32 0.5, %v138_v5 }
 0x192   :  { %v466_v9 = vpop.eup %465  ;;  %v140_v10 = vsub.f32 1.5, %v139_v7 }
 0x193   :  { %v127_v11 = vmul.f32 %v466_v9, %v124_v63  ;;  %vm133_vm5 = vweird.f32 %v466_v9 }
 0x194   :  { %v141_v12 = vmul.f32 %v464_v3, %v140_v10  ;;  %vm134_vm7 = vmor %vm132_vm6, %vm133_vm5  ;;  %vm396_vm6 = vcmask 1040384  }
 0x195   :  { %v128_v13 = vmul.f32 %v466_v9, %v127_v11 }
 0x196   :  { %v145_v14 = vsel %vm144_vm4, %v464_v3, %v141_v12 }
 0x197   :  { %v129_v15 = vmul.f32 0.5, %v128_v13  ;;  %v148_v16 = vmul.f32 %v145_v14, %v108_v44  ;;  %v149_v17 = vmul.f32 %v145_v14, %v109_v45  ;;  %v164_v25 = vpop.permute.xlu2 %163 }
 0x198   :  { %v625_v48 = vpop.permute.xlu1 %298 }
 0x199   :  { %v130_v19 = vsub.f32 1.5, %v129_v15  ;;  %v160_v20 = vmul.f32 %v156_v6, %v148_v16  ;;  %v161_v21 = vmul.f32 %v156_v6, %v149_v17 }
 0x19b   :  { %v131_v22 = vmul.f32 %v466_v9, %v130_v19  ;;  %v172_v23 = vadd.f32 %v168_v18, %v160_v20  ;;  %v173_v24 = vadd.f32 %v168_v18, %v161_v21 }
 0x19d   :  { %v135_v26 = vsel %vm134_vm7, %v466_v9, %v131_v22  ;;  %v176_v27 = vmax.f32 %v172_v23, 0.0  ;;  %v177_v28 = vmax.f32 %v173_v24, 0.0 }
 0x19e   :  { %v146_v29 = vmul.f32 %v135_v26, %v106_v53  ;;  %v147_v30 = vmul.f32 %v135_v26, %v107_v54  ;;  %v569_v54 = vmov 15  }
 0x19f   :  { %422 = vmatpush.msk.msra.mxu0 %vm91_vm0, %v176_v27  ;;  %428 = vmatpush.msk.msra.mxu2 %vm91_vm0, %v176_v27  ;;  %v179_v38 = vpop.permute.xlu2 %178 }
 0x1a0   :  { %v158_v31 = vmul.f32 %v152_v8, %v146_v29  ;;  %v159_v32 = vmul.f32 %v152_v8, %v147_v30  ;;  %425 = vmatpush.msk.msra.mxu1 %vm91_vm0, %v177_v28  ;;  %430 = vmatpush.msk.msra.mxu3 %vm91_vm0, %v177_v28 }
 0x1a1   :  { %457 = vset.pattern.permute.xlu0 %v569_v54  ;;  %456 = vset.pattern.permute.xlu2 %v569_v54 }
 0x1a2   :  { %v170_v33 = vadd.f32 %v164_v25, %v158_v31  ;;  %v171_v34 = vadd.f32 %v164_v25, %v159_v32 }
 0x1a4   :  { %v174_v35 = vmax.f32 %v170_v33, 0.0  ;;  %v175_v36 = vmax.f32 %v171_v34, 0.0 }
 0x1a6   :  { %208 = vmatpush.msra.mxu0 %v174_v35  ;;  %429 = vmatpush.msra.mxu2 %v174_v35 }
 0x1a7   :  { %231 = vmatpush.msra.mxu1 %v175_v36  ;;  %431 = vmatpush.msra.mxu3 %v175_v36 }
 0x1a8   :  { %423 = vmatmul.msk.f32.vlgmr.msra.gmra.mxu0 %vm182_vm8, %v179_v38  ;;  %424 = vmatmul.msk.f32.vlgmr.msra.gmra.mxu2 %vm182_vm8, %v181_v37 }
 0x1a9   :  { %426 = vmatmul.msk.f32.vlgmr.msra.gmra.mxu1 %vm182_vm8, %v179_v38  ;;  %427 = vmatmul.msk.f32.vlgmr.msra.gmra.mxu3 %vm182_vm8, %v181_v37 }
 0x225   :  { %v210_v39 = vpop.f32.mrf.mxu0 }
 0x226   :  { %v233_v40 = vpop.f32.mrf.mxu1 }
 0x227   :  { %v239_v42 = vadd.f32 %v233_v40, %v210_v39 }
 0x229   :  { %240 = vadd.xlane.f32.xlu0 %v239_v42 }
 0x22b   :  { %v213_v43 = vpop.f32.mrf.mxu2 }
 0x22c   :  { %v242_v44 = vsel %vm91_vm0, %v213_v43, 0.0  ;;  %v236_v45 = vpop.f32.mrf.mxu3 }
 0x22d   :  { %v243_v46 = vsel %vm91_vm0, %v236_v45, 0.0 }
 0x22e   :  { %v244_v47 = vadd.f32 %v243_v46, %v242_v44 }
 0x230   :  { %245 = vadd.xlane.f32.xlu1 %v244_v47 }
 0x23d   :  { %306 = vperm.xlu0 %457, %v595_v2  }
 0x245   :  { %460 = vset.pattern.permute.xlu0 %v570_v0 }
 0x249   :  { %294 = vperm.xlu1 %455, %v595_v2  }
 0x251   :  { %458 = vset.pattern.permute.xlu1 %v568_v50 }
 0x29c   :  { %v241_v49 = vpop.xlane.xlu0 %240 }
 0x29d   :  { %v247_v51 = vmul.f32 %v241_v49, %v605_v41 }
 0x29f   :  { %v249_v52 = vsub.f32 %v210_v39, %v247_v51  ;;  %v250_v53 = vsub.f32 %v233_v40, %v247_v51 }
 0x2a1   :  { %v253_v55 = vmul.f32 %v249_v52, %v249_v52  ;;  %v254_v56 = vmul.f32 %v250_v53, %v250_v53 }
 0x2a3   :  { %v246_v57 = vpop.xlane.xlu1 %245  ;;  %v257_v58 = vadd.f32 %v254_v56, %v253_v55 }
 0x2a4   :  { %v248_v59 = vmul.f32 %v246_v57, %v605_v41 }
 0x2a5   :  { %258 = vadd.xlane.f32.xlu1 %v257_v58 }
 0x2a6   :  { %v251_v60 = vsub.f32 %v213_v43, %v248_v59  ;;  %v252_v61 = vsub.f32 %v236_v45, %v248_v59 }
 0x2a8   :  { %v255_v62 = vmul.f32 %v251_v60, %v251_v60  ;;  %v256_v63 = vmul.f32 %v252_v61, %v252_v61 }
 0x2aa   :  { %v260_v3 = vsel %vm91_vm0, %v255_v62, 0.0  ;;  %v261_v4 = vsel %vm91_vm0, %v256_v63, 0.0 }
 0x2ab   :  { %v262_v5 = vadd.f32 %v261_v4, %v260_v3 }
 0x2ad   :  { %263 = vadd.xlane.f32.xlu2 %v262_v5 }
 0x2af   :  { %v307_v29 = vpop.permute.xlu0 %306 }
 0x2bb   :  { %v295_v6 = vpop.permute.xlu1 %294 }
 0x2be   :  { %326 = vperm.xlu1 %458, %v593_v1  }
 0x2c5   :  { %310 = vperm.xlu2 %456, %v593_v1  }
 0x2c6   :  { %322 = vperm.xlu1 %458, %v595_v2  }
 0x2ce   :  { %459 = vset.pattern.permute.xlu1 %v570_v0 }
 0x2cf   :  { %350 = vperm.xlu1 %459, %v595_v2  }
 0x318   :  { %v259_v7 = vpop.xlane.xlu1 %258 }
 0x319   :  { %v265_v8 = vmul.f32 %v259_v7, %v605_v41 }
 0x31b   :  { %v267_v9 = vadd.f32 1e-05, %v265_v8 }
 0x31d   :  { %467 = vrsqrt.f32 %v267_v9  ;;  %vm275_vm10 = vweird.f32 %v267_v9 }
 0x320   :  { %v264_v10 = vpop.xlane.xlu2 %263 }
 0x321   :  { %v266_v11 = vmul.f32 %v264_v10, %v605_v41 }
 0x323   :  { %v468_v12 = vpop.eup %467  ;;  %v268_v13 = vadd.f32 1e-05, %v266_v11 }
 0x324   :  { %v270_v14 = vmul.f32 %v468_v12, %v267_v9  ;;  %vm276_vm9 = vweird.f32 %v468_v12 }
 0x325   :  { %469 = vrsqrt.f32 %v268_v13  ;;  %vm277_vm11 = vmor %vm275_vm10, %vm276_vm9  ;;  %vm285_vm13 = vweird.f32 %v268_v13 }
 0x326   :  { %v271_v15 = vmul.f32 %v468_v12, %v270_v14 }
 0x328   :  { %v272_v1 = vmul.f32 0.5, %v271_v15  ;;  %v311_v32 = vpop.permute.xlu2 %310 }
 0x32a   :  { %v273_v16 = vsub.f32 1.5, %v272_v1 }
 0x32b   :  { %v470_v17 = vpop.eup %469 }
 0x32c   :  { %v280_v18 = vmul.f32 %v470_v17, %v268_v13  ;;  %v274_v2 = vmul.f32 %v468_v12, %v273_v16  ;;  %vm286_vm12 = vweird.f32 %v470_v17 }
 0x32d   :  { %vm287_vm14 = vmor %vm285_vm13, %vm286_vm12 }
 0x32e   :  { %v281_v19 = vmul.f32 %v470_v17, %v280_v18  ;;  %v278_v20 = vsel %vm277_vm11, %v468_v12, %v274_v2 }
 0x32f   :  { %v289_v23 = vmul.f32 %v278_v20, %v249_v52  ;;  %v290_v41 = vmul.f32 %v278_v20, %v250_v53 }
 0x330   :  { %v282_v21 = vmul.f32 0.5, %v281_v19  ;;  %v327_v24 = vpop.permute.xlu1 %326 }
 0x331   :  { %v301_v26 = vmul.f32 %v295_v6, %v289_v23  ;;  %v302_v27 = vmul.f32 %v295_v6, %v290_v41 }
 0x332   :  { %v283_v22 = vsub.f32 1.5, %v282_v21 }
 0x333   :  { %v313_v35 = vadd.f32 %v307_v29, %v301_v26  ;;  %v314_v36 = vadd.f32 %v307_v29, %v302_v27  ;;  %v399_v26 = vlaneseq }
 0x334   :  { %v284_v25 = vmul.f32 %v470_v17, %v283_v22 }
 0x335   :  { %v317_v43 = vmax.f32 %v313_v35, 0.0  ;;  %v318_v44 = vmax.f32 %v314_v36, 0.0  ;;  %vm401_vm8 = vcmp.lt.s32.totalorder %v399_v26, 256 }
 0x336   :  { %v288_v28 = vsel %vm287_vm14, %v470_v17, %v284_v25 }
 0x337   :  { %v291_v30 = vmul.f32 %v288_v28, %v251_v60  ;;  %v292_v31 = vmul.f32 %v288_v28, %v252_v61 }
 0x338   :  { %v323_v39 = vpop.permute.xlu1 %322 }
 0x339   :  { %v303_v33 = vmul.f32 %v625_v48, %v291_v30  ;;  %v304_v34 = vmul.f32 %v625_v48, %v292_v31  ;;  %v329_v47 = vmul.f32 %v323_v39, %v317_v43  ;;  %v330_v49 = vmul.f32 %v323_v39, %v318_v44 }
 0x33b   :  { %v315_v37 = vadd.f32 %v311_v32, %v303_v33  ;;  %v316_v38 = vadd.f32 %v311_v32, %v304_v34 }
 0x33d   :  { %v319_v40 = vmax.f32 %v315_v37, 0.0  ;;  %v320_v42 = vmax.f32 %v316_v38, 0.0 }
 0x33f   :  { %v331_v45 = vmul.f32 %v327_v24, %v319_v40  ;;  %v332_v46 = vmul.f32 %v327_v24, %v320_v42 }
 0x341   :  { %v333_v50 = vsel %vm91_vm0, %v331_v45, 0.0  ;;  %v341_v51 = vsel %vm91_vm0, %v332_v46, 0.0  ;;  %v351_v63 = vpop.permute.xlu1 %350 }
 0x342   :  { %v334_v52 = vadd.f32 %v333_v50, %v329_v47  ;;  %v342_v53 = vadd.f32 %v341_v51, %v330_v49 }
 0x344   :  { %v335_v48 = vrot.slane %v334_v52, 4  ;;  %v343_v54 = vrot.slane %v342_v53, 4 }
 0x346   :  { %v336_v55 = vadd.f32 %v335_v48, %v334_v52  ;;  %v344_v56 = vadd.f32 %v343_v54, %v342_v53 }
 0x348   :  { %v337_v57 = vrot.slane %v336_v55, 2  ;;  %v345_v58 = vrot.slane %v344_v56, 2 }
 0x34a   :  { %v338_v59 = vadd.f32 %v337_v57, %v336_v55  ;;  %v346_v60 = vadd.f32 %v345_v58, %v344_v56 }
 0x34c   :  { %v339_v61 = vrot.slane %v338_v59, 1  ;;  %v347_v62 = vrot.slane %v346_v60, 1 }
 0x34e   :  { %v340_v0 = vadd.f32 %v339_v61, %v338_v59  ;;  %v348_v3 = vadd.f32 %v347_v62, %v346_v60 }
 0x350   :  { %v353_v4 = vadd.f32 %v351_v63, %v340_v0  ;;  %v354_v5 = vadd.f32 %v351_v63, %v348_v3 }
 0x352   :  { %v355_v6 = vsub.f32 0.0, %v353_v4  ;;  %v356_v7 = vsub.f32 0.0, %v354_v5 }
 0x354   :  { %v357_v8 = vmul.f32 1.442695, %v355_v6  ;;  %v359_v9 = vmul.f32 1.442695, %v356_v7 }
 0x356   :  { %471 = vpow2.f32 %v357_v8 }
 0x357   :  { %473 = vpow2.f32 %v359_v9 }
 0x35c   :  { %v472_v10 = vpop.eup %471 }
 0x35d   :  { %v474_v11 = vpop.eup %473  ;;  %v361_v12 = vadd.f32 1.0, %v472_v10 }
 0x35e   :  { %v362_v13 = vadd.f32 1.0, %v474_v11 }
 0x35f   :  { %475 = vrcp.f32 %v361_v12  ;;  %vm368_vm1 = vweird.f32 %v361_v12  ;;  %v374_v23 = vand.u32 2147483648, %v361_v12  ;;  %v372_v24 = vand.u32 2147483647, %v361_v12 }
 0x360   :  { %477 = vrcp.f32 %v362_v13  ;;  %v389_v19 = vand.u32 2147483648, %v362_v13  ;;  %v387_v21 = vand.u32 2147483647, %v362_v13  ;;  %vm383_vm3 = vweird.f32 %v362_v13 }
 0x361   :  { %v375_v30 = vor.u32 1.1754944e-38, %v374_v23  ;;  %vm373_vm7 = vcmp.eq.f32.partialorder %v372_v24, 8.507059e+37 }
 0x362   :  { %v390_v27 = vor.u32 1.1754944e-38, %v389_v19  ;;  %vm388_vm5 = vcmp.eq.f32.partialorder %v387_v21, 8.507059e+37 }
 0x365   :  { %v476_v14 = vpop.eup %475 }
 0x366   :  { %v478_v15 = vpop.eup %477  ;;  %v364_v1 = vmul.f32 %v476_v14, %v361_v12  ;;  %vm369_vm15 = vweird.f32 %v476_v14 }
 0x367   :  { %v379_v16 = vmul.f32 %v478_v15, %v362_v13  ;;  %vm384_vm0 = vweird.f32 %v478_v15  ;;  %vm642_vm2 = vmor %vm368_vm1, %vm369_vm15 }
 0x368   :  { %v365_v17 = vsub.f32 1.0, %v364_v1  ;;  %vm385_vm4 = vmor %vm383_vm3, %vm384_vm0 }
 0x369   :  { %v380_v18 = vsub.f32 1.0, %v379_v16 }
 0x36a   :  { %v366_v2 = vmul.f32 %v476_v14, %v365_v17 }
 0x36b   :  { %v381_v20 = vmul.f32 %v478_v15, %v380_v18 }
 0x36c   :  { %v367_v22 = vadd.f32 %v476_v14, %v366_v2 }
 0x36d   :  { %v382_v25 = vadd.f32 %v478_v15, %v381_v20 }
 0x36e   :  { %v371_v28 = vsel %vm642_vm2, %v476_v14, %v367_v22 }
 0x36f   :  { %v386_v29 = vsel %vm385_vm4, %v478_v15, %v382_v25  ;;  %v376_v33 = vsel %vm373_vm7, %v375_v30, %v371_v28 }
 0x370   :  { %v391_v31 = vsel %vm388_vm5, %v390_v27, %v386_v29 }
 0x371   :  { %v395_v32 = vrot.slane %v391_v31, 7 }
 0x373   :  { %v397_v34 = vsel %vm396_vm6, %v376_v33, %v395_v32 }
 0x374   :  { %403 = vst.msk [vmem:[#allocation7] sm:$0x3] %vm401_vm8, %v397_v34 }
 0x375   :  { %414 = dma.vmem_to_hbm [thread:$0]  %s410_s21, 32, %s412_s24, [#allocation4]  }
 0x376   :  { %555 = dma.done.wait [#allocation4], 32  }
 0x377   :  { %556 = vsyncadd [#allocation4], 4294967264 }
 0x378   :  { %419 = vsyncpa [#allocation3], 1 }
 0x379   :  { %420 = vsyncpa [#allocation6], 1 }
 0x37a   :  { %421 = vsyncpa [#allocation4], 1 }

</bundles_post_ra>
